<compile_context>
chip_gen: v5e
topology: v5e:2x2
jax: 0.10.0
libtpu: 0.0.40
codegen_flags: <defaults>
</compile_context>

<pallas_src>
import jax
import jax.numpy as jnp
from jax.experimental import pallas as pl
from jax.experimental.pallas import tpu as pltpu

C_COND = 32   # condition channels (x[1])
C_FEAT = 64   # feature channels   (x[0])


def sft_kernel(feat_ref, cond_ref, w0_ref, b0_ref, w1_ref, b1_ref, out_ref):
    # MXU matmuls in bf16 with f32 accumulation (weights are already bf16).
    cond = cond_ref[...].astype(jnp.bfloat16)                 # (32, T)

    # fused conv0 (both branches): rows 0:32 = scale hidden, rows 32:64 = shift hidden
    h = jnp.dot(w0_ref[...], cond,
                preferred_element_type=jnp.float32) + b0_ref[...]     # (64, T) f32
    h = jnp.maximum(h, 0.1 * h)                                        # leaky_relu(0.1)

    # fused block-diagonal conv1: rows 0:64 = scale + 1 (bias folded), 64:128 = shift
    ss = jnp.dot(w1_ref[...], h.astype(jnp.bfloat16),
                 preferred_element_type=jnp.float32) + b1_ref[...]     # (128, T) f32

    feat = feat_ref[...]                                               # (64, T)
    if feat.dtype == jnp.float32:
        out = feat * ss[:C_FEAT, :] + ss[C_FEAT:, :]
    else:
        # bf16 (or other) feature path: single downcast of ss, bf16 epilogue.
        ssd = ss.astype(feat.dtype)
        out = feat * ssd[:C_FEAT, :] + ssd[C_FEAT:, :]
    out_ref[...] = out.astype(out_ref.dtype)


def _prep_weights(params):
    """Fuse the four 1x1 convs into two matmul weights (+ biases, +1 folded)."""
    ws0 = params["scale_conv0_w"][:, :, 0, 0]     # (32, 32)
    wh0 = params["shift_conv0_w"][:, :, 0, 0]     # (32, 32)
    ws1 = params["scale_conv1_w"][:, :, 0, 0]     # (64, 32)
    wh1 = params["shift_conv1_w"][:, :, 0, 0]     # (64, 32)

    # Matmul weights in bf16 (MXU-native); biases stay f32 (added post-accum).
    w0 = jnp.concatenate([ws0, wh0], axis=0).astype(jnp.bfloat16)            # (64, 32)
    b0 = jnp.concatenate([params["scale_conv0_b"],
                          params["shift_conv0_b"]])[:, None].astype(jnp.float32)   # (64, 1)

    z = jnp.zeros_like(ws1)
    w1 = jnp.concatenate(
        [jnp.concatenate([ws1, z], axis=1),        # scale branch reads h[0:32]
         jnp.concatenate([z, wh1], axis=1)],       # shift branch reads h[32:64]
        axis=0).astype(jnp.bfloat16)                                          # (128, 64)
    b1 = jnp.concatenate([params["scale_conv1_b"] + 1.0,                     # fold "+1"
                          params["shift_conv1_b"]])[:, None].astype(jnp.float32)   # (128, 1)
    return w0, b0, w1, b1


def _vmem_limit_bytes():
    """Explicit scoped-VMEM budget: ~64 MiB on v5e/v6e, ~48 MiB on v7x."""
    try:
        cap = pltpu.get_tpu_info().vmem_capacity_bytes
    except Exception:
        cap = 128 << 20
    return int(min(64 << 20, max(32 << 20, cap - (16 << 20))))


def _choose_tile_hw(N, HW, max_tile_hw):
    """Pick the pixel tile.  Prefer one full-extent tile; otherwise a large
    128-multiple.  On v7x the 'parallel' grid axes shard over 2 TensorCores,
    so keep the total step count even (or plentiful) to avoid imbalance."""
    tile = HW if HW <= max_tile_hw else max_tile_hw
    grid_hw = pl.cdiv(HW, tile)
    total = N * grid_hw
    if total < 8 and total % 2 == 1 and HW >= 256:
        for extra in range(1, 5):
            cand_grid = grid_hw + extra
            cand_tile = max(128, pl.cdiv(pl.cdiv(HW, cand_grid), 128) * 128)
            cand_grid = pl.cdiv(HW, cand_tile)
            if (N * cand_grid) % 2 == 0:
                return cand_tile, cand_grid
    return tile, grid_hw


def sft_layer(feat_nchw, cond_nchw, params, *, max_tile_hw=8192):
    """feat_nchw: (N, 64, H, W); cond_nchw: (N, 32, H, W). Returns (N, 64, H, W)."""
    N, Cf, H, W = feat_nchw.shape
    _, Cc, _, _ = cond_nchw.shape
    assert Cf == C_FEAT and Cc == C_COND
    HW = H * W

    # Free views (contiguous reshape): no transpose, no pad, no extra HBM pass.
    feat = feat_nchw.reshape(N, C_FEAT, HW)
    cond = cond_nchw.reshape(N, C_COND, HW)

    tile_hw, grid_hw = _choose_tile_hw(N, HW, max_tile_hw)

    w0, b0, w1, b1 = _prep_weights(params)

    grid = (N, grid_hw)
    full = lambda shape: pl.BlockSpec(shape, lambda n, j: (0, 0))

    out = pl.pallas_call(
        sft_kernel,
        out_shape=jax.ShapeDtypeStruct((N, C_FEAT, HW), feat_nchw.dtype),
        grid_spec=pltpu.PrefetchScalarGridSpec(
            num_scalar_prefetch=0,
            grid=grid,
            in_specs=[
                pl.BlockSpec((None, C_FEAT, tile_hw), lambda n, j: (n, 0, j)),  # feat
                pl.BlockSpec((None, C_COND, tile_hw), lambda n, j: (n, 0, j)),  # cond
                full((2 * C_COND, C_COND)),        # w0  (64, 32)  bf16
                full((2 * C_COND, 1)),             # b0  (64, 1)   f32
                full((2 * C_FEAT, 2 * C_COND)),    # w1  (128, 64) bf16 block-diag
                full((2 * C_FEAT, 1)),             # b1  (128, 1)  f32, +1 folded
            ],
            out_specs=pl.BlockSpec((None, C_FEAT, tile_hw), lambda n, j: (n, 0, j)),
        ),
        compiler_params=pltpu.CompilerParams(
            dimension_semantics=("parallel", "parallel"),
            vmem_limit_bytes=_vmem_limit_bytes()),
    )(feat, cond, w0, b0, w1, b1)

    return out.reshape(N, C_FEAT, H, W)


def init_params(key):
    ks = jax.random.split(key, 8)
    def w(k, cout, cin):
        return (jax.random.normal(k, (cout, cin, 1, 1), jnp.float32)
                * (1.0 / jnp.sqrt(cin)))
    def b(k, cout):
        return jax.random.normal(k, (cout,), jnp.float32) * 0.01
    return {
        "scale_conv0_w": w(ks[0], C_COND, C_COND), "scale_conv0_b": b(ks[1], C_COND),
        "scale_conv1_w": w(ks[2], C_FEAT, C_COND), "scale_conv1_b": b(ks[3], C_FEAT),
        "shift_conv0_w": w(ks[4], C_COND, C_COND), "shift_conv0_b": b(ks[5], C_COND),
        "shift_conv1_w": w(ks[6], C_FEAT, C_COND), "shift_conv1_b": b(ks[7], C_FEAT),
    }


def sft_reference(feat, cond, params):
    """Pure-JAX f32 reference mirroring the PyTorch forward (NCHW)."""
    def conv1x1(x, wkey, bkey):
        w = params[wkey][:, :, 0, 0]            # (Cout, Cin)
        b = params[bkey]
        y = jnp.einsum("nchw,oc->nohw", x, w)
        return y + b[None, :, None, None]
    hs = jax.nn.leaky_relu(conv1x1(cond, "scale_conv0_w", "scale_conv0_b"), 0.1)
    scale = conv1x1(hs, "scale_conv1_w", "scale_conv1_b")
    ht = jax.nn.leaky_relu(conv1x1(cond, "shift_conv0_w", "shift_conv0_b"), 0.1)
    shift = conv1x1(ht, "shift_conv1_w", "shift_conv1_b")
    return feat * (scale + 1.0) + shift


if __name__ == "__main__":
    key = jax.random.PRNGKey(0)
    kf, kc, kp = jax.random.split(key, 3)

    N, H, W = 2, 8, 8
    feat = jax.random.normal(kf, (N, C_FEAT, H, W), jnp.float32)   # x[0]
    cond = jax.random.normal(kc, (N, C_COND, H, W), jnp.float32)   # x[1]
    params = init_params(kp)

    out = sft_layer(feat, cond, params)
    out = jax.block_until_ready(out)

    ref = sft_reference(feat, cond, params)
    assert out.shape == (N, C_FEAT, H, W)
    # Tolerance loosened vs f32 reference: weights/activations are rounded to
    # bf16 for the MXU (accumulation stays f32).
    assert jnp.allclose(out, ref, atol=1e-1, rtol=5e-2), "mismatch vs reference"

    print("KERNEL_OK")
</pallas_src>

<mosaic_0001>
module attributes {stable_mosaic.version = 11 : i64} {
  func.func @sft_kernel(%arg0: i32, %arg1: i32, %arg2: memref<1x64x64xf32, #tpu.memory_space<vmem>>, %arg3: memref<1x32x64xf32, #tpu.memory_space<vmem>>, %arg4: memref<64x32xbf16, #tpu.memory_space<vmem>>, %arg5: memref<64x1xf32, #tpu.memory_space<vmem>>, %arg6: memref<128x64xbf16, #tpu.memory_space<vmem>>, %arg7: memref<128x1xf32, #tpu.memory_space<vmem>>, %arg8: memref<1x64x64xf32, #tpu.memory_space<vmem>>) attributes {dimension_semantics = [#tpu.dimension_semantics<parallel>, #tpu.dimension_semantics<parallel>], iteration_bounds = array<i64: 2, 1>, scalar_prefetch = 0 : i64, scratch_operands = 0 : i64, tpu.core_type = #tpu.core_type<tc>, window_params = [{transform_indices = @transform_0, window_bounds = array<i64: 1, 64, 64>}, {transform_indices = @transform_1, window_bounds = array<i64: 1, 32, 64>}, {pipeline_mode = #tpu.pipeline_mode<synchronous>, transform_indices = @transform_2, window_bounds = array<i64: 64, 32>}, {pipeline_mode = #tpu.pipeline_mode<synchronous>, transform_indices = @transform_3, window_bounds = array<i64: 64, 1>}, {pipeline_mode = #tpu.pipeline_mode<synchronous>, transform_indices = @transform_4, window_bounds = array<i64: 128, 64>}, {pipeline_mode = #tpu.pipeline_mode<synchronous>, transform_indices = @transform_5, window_bounds = array<i64: 128, 1>}, {transform_indices = @transform_6, window_bounds = array<i64: 1, 64, 64>}]} {
    %c0 = arith.constant 0 : index
    %c0_0 = arith.constant 0 : index
    %c0_1 = arith.constant 0 : index
    %0 = vector.load %arg3[%c0, %c0_0, %c0_1] : memref<1x32x64xf32, #tpu.memory_space<vmem>>, vector<1x32x64xf32>
    %1 = vector.shape_cast %0 : vector<1x32x64xf32> to vector<32x64xf32>
    %2 = arith.truncf %1 : vector<32x64xf32> to vector<32x64xbf16>
    %c0_2 = arith.constant 0 : index
    %c0_3 = arith.constant 0 : index
    %3 = vector.load %arg4[%c0_2, %c0_3] : memref<64x32xbf16, #tpu.memory_space<vmem>>, vector<64x32xbf16>
    %cst = arith.constant dense<0.000000e+00> : vector<64x64xf32>
    %4 = tpu.matmul %3, %2, %cst {dimension_numbers = #tpu.dot_dimension_numbers<[1], [0], [0], [1], [0, 0, 1, 1], [], []>} : vector<64x32xbf16>, vector<32x64xbf16>, vector<64x64xf32> -> vector<64x64xf32>
    %c0_4 = arith.constant 0 : index
    %c0_5 = arith.constant 0 : index
    %5 = vector.load %arg5[%c0_4, %c0_5] : memref<64x1xf32, #tpu.memory_space<vmem>>, vector<64x1xf32>
    %6 = vector.broadcast %5 : vector<64x1xf32> to vector<64x64xf32>
    %7 = arith.addf %4, %6 : vector<64x64xf32>
    %cst_6 = arith.constant 1.000000e-01 : f32
    %8 = vector.broadcast %cst_6 : f32 to vector<64x64xf32>
    %9 = arith.mulf %8, %7 : vector<64x64xf32>
    %10 = arith.maximumf %7, %9 : vector<64x64xf32>
    %c0_7 = arith.constant 0 : index
    %c0_8 = arith.constant 0 : index
    %11 = vector.load %arg6[%c0_7, %c0_8] : memref<128x64xbf16, #tpu.memory_space<vmem>>, vector<128x64xbf16>
    %12 = arith.truncf %10 : vector<64x64xf32> to vector<64x64xbf16>
    %cst_9 = arith.constant dense<0.000000e+00> : vector<128x64xf32>
    %13 = tpu.matmul %11, %12, %cst_9 {dimension_numbers = #tpu.dot_dimension_numbers<[1], [0], [0], [1], [0, 0, 1, 1], [], []>} : vector<128x64xbf16>, vector<64x64xbf16>, vector<128x64xf32> -> vector<128x64xf32>
    %c0_10 = arith.constant 0 : index
    %c0_11 = arith.constant 0 : index
    %14 = vector.load %arg7[%c0_10, %c0_11] : memref<128x1xf32, #tpu.memory_space<vmem>>, vector<128x1xf32>
    %15 = vector.broadcast %14 : vector<128x1xf32> to vector<128x64xf32>
    %16 = arith.addf %13, %15 : vector<128x64xf32>
    %c0_12 = arith.constant 0 : index
    %c0_13 = arith.constant 0 : index
    %c0_14 = arith.constant 0 : index
    %17 = vector.load %arg2[%c0_12, %c0_13, %c0_14] : memref<1x64x64xf32, #tpu.memory_space<vmem>>, vector<1x64x64xf32>
    %18 = vector.shape_cast %17 : vector<1x64x64xf32> to vector<64x64xf32>
    %19 = vector.extract_strided_slice %16 {offsets = [0, 0], sizes = [64, 64], strides = [1, 1]} : vector<128x64xf32> to vector<64x64xf32>
    %20 = arith.mulf %18, %19 : vector<64x64xf32>
    %21 = vector.extract_strided_slice %16 {offsets = [64, 0], sizes = [64, 64], strides = [1, 1]} : vector<128x64xf32> to vector<64x64xf32>
    %22 = arith.addf %20, %21 : vector<64x64xf32>
    %c0_15 = arith.constant 0 : index
    %c0_16 = arith.constant 0 : index
    %c0_17 = arith.constant 0 : index
    %23 = vector.load %arg8[%c0_15, %c0_16, %c0_17] : memref<1x64x64xf32, #tpu.memory_space<vmem>>, vector<1x64x64xf32>
    %24 = vector.shape_cast %23 : vector<1x64x64xf32> to vector<64x64xf32>
    %25 = vector.shape_cast %22 : vector<64x64xf32> to vector<1x64x64xf32>
    tpu.vector_store %arg8[%c0_15, %c0_16, %c0_17], %25 {strides = array<i32>} : memref<1x64x64xf32, #tpu.memory_space<vmem>>, vector<1x64x64xf32>,
    return
  }
  func.func @transform_0(%arg0: i32, %arg1: i32) -> (i32, i32, i32) {
    %c0_i32 = arith.constant 0 : i32
    %c0_i32_0 = arith.constant 0 : i32
    return %arg0, %c0_i32, %arg1 : i32, i32, i32
  }
  func.func @transform_1(%arg0: i32, %arg1: i32) -> (i32, i32, i32) {
    %c0_i32 = arith.constant 0 : i32
    %c0_i32_0 = arith.constant 0 : i32
    return %arg0, %c0_i32, %arg1 : i32, i32, i32
  }
  func.func @transform_2(%arg0: i32, %arg1: i32) -> (i32, i32) {
    %c0_i32 = arith.constant 0 : i32
    %c0_i32_0 = arith.constant 0 : i32
    %c0_i32_1 = arith.constant 0 : i32
    return %c0_i32, %c0_i32_0 : i32, i32
  }
  func.func @transform_3(%arg0: i32, %arg1: i32) -> (i32, i32) {
    %c0_i32 = arith.constant 0 : i32
    %c0_i32_0 = arith.constant 0 : i32
    %c0_i32_1 = arith.constant 0 : i32
    return %c0_i32, %c0_i32_0 : i32, i32
  }
  func.func @transform_4(%arg0: i32, %arg1: i32) -> (i32, i32) {
    %c0_i32 = arith.constant 0 : i32
    %c0_i32_0 = arith.constant 0 : i32
    %c0_i32_1 = arith.constant 0 : i32
    return %c0_i32, %c0_i32_0 : i32, i32
  }
  func.func @transform_5(%arg0: i32, %arg1: i32) -> (i32, i32) {
    %c0_i32 = arith.constant 0 : i32
    %c0_i32_0 = arith.constant 0 : i32
    %c0_i32_1 = arith.constant 0 : i32
    return %c0_i32, %c0_i32_0 : i32, i32
  }
  func.func @transform_6(%arg0: i32, %arg1: i32) -> (i32, i32, i32) {
    %c0_i32 = arith.constant 0 : i32
    %c0_i32_0 = arith.constant 0 : i32
    return %arg0, %c0_i32, %arg1 : i32, i32, i32
  }
}

</mosaic_0001>

<bundles_post_ra>
// kernel: tpu_custom_call.1
= control target key start
LH: loop header
LB: loop body
LE: loop exit
PB: predicated region body
PF: predicated region fallthrough
CT: control target
= control target key end

     0   :  { %11 = vsyncpa [#allocation3], 0  ;;  %s1365_s0 = inlined_call_operand.vmem [shape: f32[2,64,64], index: 0, kind: input, shape index: {}]   ;;  %s1366_s1 = inlined_call_operand.vmem [shape: f32[2,32,64], index: 1, kind: input, shape index: {}]   ;;  %s1367_s2 = inlined_call_operand.vmem [shape: bf16[64,32], index: 2, kind: input, shape index: {}]   ;;  %s1368_s3 = inlined_call_operand.vmem [shape: f32[64,1], index: 3, kind: input, shape index: {}]   ;;  %s1369_s4 = inlined_call_operand.vmem [shape: bf16[128,64], index: 4, kind: input, shape index: {}]   ;;  %s1370_s5 = inlined_call_operand.vmem [shape: f32[128,1], index: 5, kind: input, shape index: {}]   ;;  %s1371_s6 = inlined_call_operand.hbm [shape: f32[2,64,64], index: 6, kind: output, shape index: {}]  }
   0x1   :  { %13 = vsyncpa [#allocation3 + $0x1], 0  ;;  %s1099_s21 = smov 0   ;;  %s1101_s22 = smov 0  }
   0x2   :  { %s1103_s23 = smov 0   ;;  %s1105_s24 = smov 0  }
   0x3   :  { %s1107_s25 = smov 0   ;;  %s1109_s26 = smov 0  }
   0x4 LB: > { %s822_s27 = sadd.s32 4294967295, %s1059_s26   ;;  %s823_s28 = sadd.s32 4294967294, %s1059_s26   ;;  %s1059_s26 = sphi %s1109_s26, %s19_s26   ;;  %s1055_s25 = sphi %s1107_s25, %s1378_s25   ;;  %s1051_s24 = sphi %s1105_s24, %s1377_s24   ;;  %s1047_s23 = sphi %s1103_s23, %s1376_s23   ;;  %s1043_s22 = sphi %s1101_s22, %s1375_s22   ;;  %s1039_s21 = sphi %s1099_s21, %s1374_s21  }
   0x5   : > { %s31_s29 = sadd.s32 1, %s1055_s25  ;;  %s180_s30 = sadd.s32 1, %s1047_s23 }
   0x6   : > { %p33_p0 = scmp.ge.s32.totalorder %s31_s29, 2  ;;  %p190_p1 = scmp.ne.s32.totalorder %s1047_s23, %s1043_s22 }
   0x7   : > { %p191_p2 = scmp.eq.s32.totalorder %s822_s27, 1  ;;  %p196_p3 = scmp.ne.s32.totalorder %s1043_s22, %s1039_s21 }
   0x8   : > { %s1380_s29 = smov (%p33_p0, %s31_s29), 0  ;;  %p197_p5 = scmp.eq.s32.totalorder %s823_s28, 1 }
   0x9   : > { %p1139_p4 = por %p191_p2, %p190_p1  ;;  %s175_s8 = ssub.s32 %s1055_s25, %s1380_s29 }
   0xa   : > { %p826_p6 = scmp.ge.s32.totalorder %s1059_s26, 1  ;;  %p178_p7 = scmp.eq.s32.totalorder %s175_s8, 0 }
   0xb   : > { %p1146_p8 = por %p197_p5, %p196_p3  ;;  %p249_p9 = scmp.lt.s32.totalorder %s1059_s26, 3 }
   0xc   : > { %s1152_s10 = scalar_select %p178_p7, %s1047_s23, %s180_s30  }
   0xd   : > { %p250_p10 = pnand %p826_p6, %p249_p9 }
   0xe   : > { %p290_p11 = scmp.lt.s32.totalorder (!%p250_p10), %s1051_s24, 1  ;;  %s287_s13 = sand.u32 (!%p250_p10), 1, %s1043_s22  }
   0xf   : > { %253 = sbr.rel (%p250_p10) target bundleno = 419 (0x1a3), region = 44  ;;  %s827_s14 = sshll.u32 (!%p250_p10), %s287_s13, 6 }
  0x10   : > { %s710_s27 = scalar_lea.sflag (!%p250_p10), [#allocation3], %s287_s13 }
  0x14   : > { %v327_v0 = vld [vmem:[%s1368_s3 + $0x30] sm:$0xff]  ;;  %v1061_v1 = vmov 0   ;;  %v325_v2 = vld [vmem:[%s1368_s3 + $0x20] sm:$0xff]  ;;  %s1162_s15 = scalar_select %p290_p11, %s1051_s24, 1  ;;  %v328_v8 = vld [vmem:[%s1368_s3 + $0x38] sm:$0xff]  ;;  %vm389_vm0 = vcmask 261120  }
  0x15   : > { %978 = vset.pattern.permute.xlu0 %v1061_v1  ;;  %979 = vset.pattern.permute.xlu1 %v1061_v1  ;;  %v326_v9 = vld [vmem:[%s1368_s3 + $0x28] sm:$0xff]  ;;  %v899_v11 = vld [vmem:[%s1367_s2] sm:$0xff]  ;;  %v323_v14 = vld [vmem:[%s1368_s3 + $0x10] sm:$0xff]  ;;  %vm603_vm1 = vcmask 523264  }
  0x16   : > { %361 = vperm.xlu0 %978, %v327_v0   ;;  %351 = vperm.xlu1 %979, %v325_v2   ;;  %s898_s16 = sshll.u32 %s1162_s15, 5  ;;  %v321_v12 = vld [vmem:[%s1368_s3] sm:$0xff]  ;;  %v322_v13 = vld [vmem:[%s1368_s3 + $0x8] sm:$0xff]  ;;  %v324_v15 = vld [vmem:[%s1368_s3 + $0x18] sm:$0xff]  ;;  %s897_s30 = sshll.u32 %s1162_s15, 6 }
  0x17   : > { %980 = vset.pattern.permute.xlu2 %v1061_v1  ;;  %s305_s19 = scalar_lea.vmem %s1366_s1, %s898_s16  ;;  %v468_v16 = vld [vmem:[%s1370_s5 + $0x8] sm:$0xff]  ;;  %v469_v17 = vld [vmem:[%s1370_s5 + $0x10] sm:$0xff]  ;;  %v471_v19 = vld [vmem:[%s1370_s5 + $0x20] sm:$0xff]  ;;  %s1292_s12 = scalar_lea.vmem %s1365_s0, %s897_s30 }
  0x18   : > { %v309_v3 = vld [vmem:[%s305_s19 + $0x10] sm:$0xff]  ;;  %v310_v4 = vld [vmem:[%s305_s19 + $0x18] sm:$0xff]  ;;  %v307_v5 = vld [vmem:[%s305_s19] sm:$0xff]  ;;  %341 = vperm.xlu2 %980, %v323_v14   ;;  %s1299_s15 = scalar_lea.vmem [#allocation2], %s827_s14  ;;  %s911_s16 = sshll.u32 %s1051_s24, 6 }
  0x19   : > { %v312_v6 = vpack.c.bf16 %v310_v4, %v309_v3  ;;  %v308_v7 = vld [vmem:[%s305_s19 + $0x8] sm:$0xff]  ;;  %v467_v21 = vld [vmem:[%s1370_s5] sm:$0xff]  ;;  %v470_v22 = vld [vmem:[%s1370_s5 + $0x18] sm:$0xff]  ;;  %s722_s19 = scalar_lea.hbm %s1371_s6, %s911_s16  ;;  %s723_s24 = sshll.u32 %s1299_s15, 4  ;;  %s724_s24 = int_to_ptr.vmem [resolvable:$true] %s723_s24 }
  0x1a   : > { %v311_v10 = vpack.c.bf16 %v308_v7, %v307_v5  ;;  %v900_v18 = vld [vmem:[%s1367_s2 + $0x8] sm:$0xff]  ;;  %v474_v23 = vld [vmem:[%s1370_s5 + $0x38] sm:$0xff]  ;;  %v475_v24 = vld [vmem:[%s1370_s5 + $0x40] sm:$0xff]  ;;  %s725_s20 = sshll.u32 %s722_s19, 4  ;;  %s726_s20 = int_to_ptr.hbm [resolvable:$true] %s725_s20 }
  0x1b   : > { %408 = vmatpush.bf16.msra.mxu0 %v312_v6  ;;  %v472_v20 = vld [vmem:[%s1370_s5 + $0x28] sm:$0xff]  ;;  %v901_v25 = vld [vmem:[%s1367_s2 + $0x10] sm:$0xff]  ;;  %v478_v28 = vld [vmem:[%s1370_s5 + $0x58] sm:$0xff]  ;;  %s995_s28 = sshra.s32 %s726_s20, 4  ;;  %s996_s28 = int_to_ptr.hbm [resolvable:$true] %s995_s28 }
  0x1c   : > { %v473_v26 = vld [vmem:[%s1370_s5 + $0x30] sm:$0xff]  ;;  %v476_v29 = vld [vmem:[%s1370_s5 + $0x48] sm:$0xff]  ;;  %v902_v32 = vld [vmem:[%s1367_s2 + $0x18] sm:$0xff]  ;;  %s997_s30 = scalar_lea.hbm %s996_s28, 64  ;;  %p1002_p1 = scmp.lt.s32.totalorder %s996_s28, %s1371_s6 }
  0x1d   : > { %v477_v27 = vld [vmem:[%s1370_s5 + $0x50] sm:$0xff]  ;;  %v480_v30 = vld [vmem:[%s1370_s5 + $0x68] sm:$0xff]  ;;  %v479_v33 = vld [vmem:[%s1370_s5 + $0x60] sm:$0xff]  ;;  %p998_p12 = scmp.ne.s32.totalorder %s996_s28, %s997_s30 }
  0x1e   : > { %366 = vperm.xlu0 %978, %v328_v8   ;;  %356 = vperm.xlu1 %979, %v326_v9   ;;  %v481_v31 = vld [vmem:[%s1370_s5 + $0x70] sm:$0xff]  ;;  %v482_v34 = vld [vmem:[%s1370_s5 + $0x78] sm:$0xff] }
  0x1f   : > { %409 = vmatpush.bf16.msra.mxu0 %v311_v10  ;;  %p999_p13 = pnand %p998_p12, %p1139_p4 }
  0x20   : > { %346 = vperm.xlu2 %980, %v324_v15   ;;  %v903_v15 = vld [vmem:[%s1369_s4] sm:$0xff] }
  0x21   : > { %p1000_p0 = pneg %p999_p13 }
  0x22   : > { %848 = vmatmul.msk.bf16.vlgmr.msra.gmra.mxu0 %vm389_vm0, %v899_v11 }
  0x26   : > { %331 = vperm.xlu0 %978, %v321_v12   ;;  %336 = vperm.xlu1 %979, %v322_v13  }
  0x28   : > { %485 = vperm.xlu2 %980, %v467_v21   ;;  %v905_v21 = vld [vmem:[%s1369_s4 + $0x10] sm:$0xff] }
  0x2e   : > { %490 = vperm.xlu0 %978, %v468_v16   ;;  %495 = vperm.xlu1 %979, %v469_v17   ;;  %v906_v16 = vld [vmem:[%s1369_s4 + $0x18] sm:$0xff]  ;;  %v909_v17 = vld [vmem:[%s1369_s4 + $0x30] sm:$0xff] }
  0x30   : > { %500 = vperm.xlu2 %980, %v470_v22   ;;  %v908_v22 = vld [vmem:[%s1369_s4 + $0x28] sm:$0xff] }
  0x32   : > { %849 = vmatmul.msk.bf16.gmra.mxu0 %vm389_vm0, %v900_v18  ;;  %v904_v18 = vld [vmem:[%s1369_s4 + $0x8] sm:$0xff] }
  0x36   : > { %505 = vperm.xlu0 %978, %v471_v19   ;;  %510 = vperm.xlu1 %979, %v472_v20   ;;  %v907_v19 = vld [vmem:[%s1369_s4 + $0x20] sm:$0xff]  ;;  %v910_v20 = vld [vmem:[%s1369_s4 + $0x38] sm:$0xff] }
  0x38   : > { %515 = vperm.xlu2 %980, %v473_v26  }
  0x3e   : > { %520 = vperm.xlu0 %978, %v474_v23   ;;  %525 = vperm.xlu1 %979, %v475_v24  }
  0x40   : > { %530 = vperm.xlu2 %980, %v476_v29  }
  0x42   : > { %850 = vmatmul.msk.bf16.gmra.mxu0 %vm389_vm0, %v901_v25 }
  0x46   : > { %535 = vperm.xlu0 %978, %v477_v27   ;;  %540 = vperm.xlu1 %979, %v478_v28  }
  0x48   : > { %545 = vperm.xlu2 %980, %v479_v33  }
  0x4e   : > { %550 = vperm.xlu0 %978, %v480_v30   ;;  %555 = vperm.xlu1 %979, %v481_v31  }
  0x50   : > { %560 = vperm.xlu2 %980, %v482_v34  }
  0x52   : > { %851 = vmatmul.msk.bf16.gmra.mxu0 %vm389_vm0, %v902_v32 }
  0x72   : > { %v342_v43 = vpop.permute.xlu2 %341 }
  0x7a   : > { %v347_v53 = vpop.permute.xlu2 %346 }
  0x82   : > { %v486_v23 = vpop.permute.xlu2 %485 }
  0x88   : > { %v352_v40 = vpop.permute.xlu1 %351  ;;  %v362_v42 = vpop.permute.xlu0 %361 }
  0x8a   : > { %v1282_v25 = vpop.permute.xlu2 %500 }
  0x90   : > { %v357_v45 = vpop.permute.xlu1 %356  ;;  %v367_v46 = vpop.permute.xlu0 %366 }
  0x92   : > { %v516_v28 = vpop.permute.xlu2 %515 }
  0x98   : > { %v337_v57 = vpop.permute.xlu1 %336  ;;  %v332_v62 = vpop.permute.xlu0 %331 }
  0x9a   : > { %v531_v34 = vpop.permute.xlu2 %530 }
  0x9f   : > { %v411_v35 = vpop.f32.mrf.mxu0 }
  0xa0   : > { %v412_v3 = vadd.f32 %v411_v35, %v332_v62  ;;  %v496_v24 = vpop.permute.xlu1 %495  ;;  %v491_v29 = vpop.permute.xlu0 %490 }
  0xa2   : > { %v431_v9 = vmul.f32 0.1, %v412_v3 }
  0xa4   : > { %v439_v13 = vmax.f32 %v412_v3, %v431_v9 }
  0xa7   : > { %v413_v36 = vpop.f32.mrf.mxu0 }
  0xa8   : > { %v414_v63 = vadd.f32 %v413_v36, %v337_v57  ;;  %v1284_v26 = vpop.permute.xlu1 %510  ;;  %v506_v35 = vpop.permute.xlu0 %505  ;;  %v678_v57 = vld [vmem:[%s1292_s12 + $0x8] sm:$0xff] }
  0xaa   : > { %v432_v6 = vmul.f32 0.1, %v414_v63 }
  0xac   : > { %v440_v11 = vmax.f32 %v414_v63, %v432_v6 }
  0xae   : > { %v463_v14 = vpack.c.bf16 %v440_v11, %v439_v13 }
  0xaf   : > { %v416_v37 = vpop.f32.mrf.mxu0 }
  0xb0   : > { %v417_v58 = vadd.f32 %v416_v37, %v342_v43  ;;  %v526_v30 = vpop.permute.xlu1 %525  ;;  %v546_v43 = vpop.permute.xlu2 %545 }
  0xb2   : > { %v433_v4 = vmul.f32 0.1, %v417_v58 }
  0xb4   : > { %v441_v10 = vmax.f32 %v417_v58, %v433_v4 }
  0xb7   : > { %v418_v38 = vpop.f32.mrf.mxu0 }
  0xb8   : > { %v419_v54 = vadd.f32 %v418_v38, %v347_v53  ;;  %v1286_v36 = vpop.permute.xlu1 %540 }
  0xba   : > { %v434_v0 = vmul.f32 0.1, %v419_v54 }
  0xbc   : > { %v442_v7 = vmax.f32 %v419_v54, %v434_v0 }
  0xbe   : > { %v464_v12 = vpack.c.bf16 %v442_v7, %v441_v10 }
  0xbf   : > { %v421_v39 = vpop.f32.mrf.mxu0 }
  0xc0   : > { %v422_v50 = vadd.f32 %v421_v39, %v352_v40 }
  0xc2   : > { %v435_v59 = vmul.f32 0.1, %v422_v50 }
  0xc4   : > { %v443_v5 = vmax.f32 %v422_v50, %v435_v59  ;;  %v684_v59 = vld [vmem:[%s1292_s12 + $0x38] sm:$0xff] }
  0xc7   : > { %v423_v41 = vpop.f32.mrf.mxu0 }
  0xc8   : > { %v424_v48 = vadd.f32 %v423_v41, %v357_v45  ;;  %v677_v41 = vld [vmem:[%s1292_s12] sm:$0xff]  ;;  %v521_v45 = vpop.permute.xlu0 %520 }
  0xca   : > { %v436_v55 = vmul.f32 0.1, %v424_v48 }
  0xcc   : > { %v444_v1 = vmax.f32 %v424_v48, %v436_v55 }
  0xce   : > { %v465_v8 = vpack.c.bf16 %v444_v1, %v443_v5  ;;  %v681_v5 = vld [vmem:[%s1292_s12 + $0x20] sm:$0xff] }
  0xcf   : > { %v426_v44 = vpop.f32.mrf.mxu0 }
  0xd0   : > { %v427_v47 = vadd.f32 %v426_v44, %v362_v42  ;;  %v683_v44 = vld [vmem:[%s1292_s12 + $0x30] sm:$0xff]  ;;  %v536_v1 = vpop.permute.xlu0 %535 }
  0xd2   : > { %v437_v51 = vmul.f32 0.1, %v427_v47 }
  0xd4   : > { %v445_v60 = vmax.f32 %v427_v47, %v437_v51  ;;  %v556_v47 = vpop.permute.xlu1 %555 }
  0xd7   : > { %v428_v49 = vpop.f32.mrf.mxu0 }
  0xd8   : > { %v429_v52 = vadd.f32 %v428_v49, %v367_v46 }
  0xda   : > { %v438_v56 = vmul.f32 0.1, %v429_v52 }
  0xdc   : > { %v446_v61 = vmax.f32 %v429_v52, %v438_v56 }
  0xde   : > { %v466_v2 = vpack.c.bf16 %v446_v61, %v445_v60  ;;  %v561_v61 = vpop.permute.xlu2 %560 }
  0xe0   : > { %632 = vmatpush.bf16.msra.mxu1 %v466_v2  ;;  %912 = vmatpush.bf16.msra.mxu2 %v466_v2 }
  0xe1   : > { %913 = vmatpush.bf16.msra.mxu3 %v466_v2 }
  0xe4   : > { %633 = vmatpush.bf16.msra.mxu1 %v465_v8  ;;  %914 = vmatpush.bf16.msra.mxu2 %v465_v8 }
  0xe5   : > { %915 = vmatpush.bf16.msra.mxu3 %v465_v8 }
  0xe8   : > { %634 = vmatpush.bf16.msra.mxu1 %v464_v12  ;;  %916 = vmatpush.bf16.msra.mxu2 %v464_v12 }
  0xe9   : > { %917 = vmatpush.bf16.msra.mxu3 %v464_v12  ;;  %v679_v12 = vld [vmem:[%s1292_s12 + $0x10] sm:$0xff] }
  0xec   : > { %635 = vmatpush.bf16.msra.mxu1 %v463_v14  ;;  %918 = vmatpush.bf16.msra.mxu2 %v463_v14 }
  0xed   : > { %919 = vmatpush.bf16.msra.mxu3 %v463_v14 }
  0xef   : > { %884 = vmatmul.msk.bf16.vlgmr.msra.gmra.mxu1 %vm603_vm1, %v903_v15  ;;  %887 = vmatmul.msk.bf16.vlgmr.msra.gmra.mxu2 %vm603_vm1, %v906_v16 }
  0xf0   : > { %890 = vmatmul.msk.bf16.vlgmr.msra.gmra.mxu3 %vm603_vm1, %v909_v17 }
  0xff   : > { %885 = vmatmul.msk.bf16.gmra.mxu1 %vm603_vm1, %v904_v18  ;;  %888 = vmatmul.msk.bf16.gmra.mxu2 %vm603_vm1, %v907_v19  ;;  %v682_v18 = vld [vmem:[%s1292_s12 + $0x28] sm:$0xff] }
 0x100   : > { %891 = vmatmul.msk.bf16.gmra.mxu3 %vm603_vm1, %v910_v20 }
 0x10f   : > { %886 = vmatmul.msk.bf16.gmra.mxu1 %vm603_vm1, %v905_v21  ;;  %889 = vmatmul.msk.bf16.gmra.mxu2 %vm603_vm1, %v908_v22  ;;  %v551_v21 = vpop.permute.xlu0 %550 }
 0x16c   : > { %v637_v27 = vpop.f32.mrf.mxu1 }
 0x16d   : > { %v638_v40 = vadd.f32 %v637_v27, %v486_v23  ;;  %v680_v27 = vld [vmem:[%s1292_s12 + $0x18] sm:$0xff]  ;;  %s1001_s12 = scalar_lea.hbm %s1371_s6, 128 }
 0x16e   : > { %p1003_p2 = scmp.lt.s32.totalorder %s1001_s12, %s997_s30 }
 0x16f   : > { %v685_v48 = vmul.f32 %v677_v41, %v638_v40 }
 0x170   : > { %p1004_p3 = por %p1003_p2, %p1002_p1 }
 0x172   : > { %v652_v31 = vpop.f32.mrf.mxu2  ;;  %p1005_p5 = pnand %p1004_p3, %p1000_p0 }
 0x173   : > { %v667_v32 = vpop.f32.mrf.mxu3  ;;  %v653_v42 = vadd.f32 %v652_v31, %v516_v28 }
 0x174   : > { %v639_v33 = vpop.f32.mrf.mxu1  ;;  %v668_v9 = vadd.f32 %v667_v32, %v546_v43 }
 0x175   : > { %v691_v51 = vmul.f32 %v683_v44, %v653_v42  ;;  %v640_v56 = vadd.f32 %v639_v33, %v491_v29 }
 0x177   : > { %v686_v62 = vmul.f32 %v678_v57, %v640_v56 }
 0x17a   : > { %v654_v37 = vpop.f32.mrf.mxu2 }
 0x17b   : > { %v669_v38 = vpop.f32.mrf.mxu3  ;;  %v655_v58 = vadd.f32 %v654_v37, %v521_v45 }
 0x17c   : > { %v642_v39 = vpop.f32.mrf.mxu1  ;;  %v670_v22 = vadd.f32 %v669_v38, %v551_v21 }
 0x17d   : > { %v692_v2 = vmul.f32 %v684_v59, %v655_v58  ;;  %v643_v10 = vadd.f32 %v642_v39, %v496_v24 }
 0x17f   : > { %v687_v15 = vmul.f32 %v679_v12, %v643_v10 }
 0x182   : > { %v657_v46 = vpop.f32.mrf.mxu2 }
 0x183   : > { %v658_v49 = vadd.f32 %v657_v46, %v526_v30  ;;  %v672_v50 = vpop.f32.mrf.mxu3 }
 0x184   : > { %v673_v52 = vadd.f32 %v672_v50, %v556_v47  ;;  %v644_v53 = vpop.f32.mrf.mxu1 }
 0x185   : > { %v693_v54 = vadd.f32 %v685_v48, %v658_v49  ;;  %v645_v23 = vadd.f32 %v644_v53, %v1282_v25 }
 0x186   : > { %v699_v55 = vadd.f32 %v691_v51, %v673_v52 }
 0x187   : > { %701 = vst.msk [vmem:[%s1299_s15] sm:$0xff] %vm603_vm1, %v693_v54 }
 0x188   : > { %707 = vst.msk [vmem:[%s1299_s15 + $0x30] sm:$0xff] %vm603_vm1, %v699_v55 }
 0x18a   : > { %v659_v60 = vpop.f32.mrf.mxu2 }
 0x18b   : > { %v660_v63 = vadd.f32 %v659_v60, %v531_v34  ;;  %v674_v0 = vpop.f32.mrf.mxu3 }
 0x18c   : > { %v675_v3 = vadd.f32 %v674_v0, %v561_v61  ;;  %v647_v4 = vpop.f32.mrf.mxu1 }
 0x18d   : > { %v694_v6 = vadd.f32 %v686_v62, %v660_v63  ;;  %v648_v7 = vadd.f32 %v647_v4, %v506_v35 }
 0x18e   : > { %v700_v8 = vadd.f32 %v692_v2, %v675_v3 }
 0x18f   : > { %702 = vst.msk [vmem:[%s1299_s15 + $0x8] sm:$0xff] %vm603_vm1, %v694_v6  ;;  %v689_v11 = vmul.f32 %v681_v5, %v648_v7 }
 0x190   : > { %708 = vst.msk [vmem:[%s1299_s15 + $0x38] sm:$0xff] %vm603_vm1, %v700_v8 }
 0x191   : > { %v697_v13 = vadd.f32 %v689_v11, %v668_v9 }
 0x192   : > { %v662_v14 = vpop.f32.mrf.mxu2 }
 0x193   : > { %705 = vst.msk [vmem:[%s1299_s15 + $0x20] sm:$0xff] %vm603_vm1, %v697_v13  ;;  %v663_v16 = vadd.f32 %v662_v14, %v536_v1 }
 0x194   : > { %v649_v17 = vpop.f32.mrf.mxu1 }
 0x195   : > { %v695_v19 = vadd.f32 %v687_v15, %v663_v16  ;;  %v650_v20 = vadd.f32 %v649_v17, %v1284_v26  ;;  %v688_v26 = vmul.f32 %v680_v27, %v645_v23 }
 0x197   : > { %703 = vst.msk [vmem:[%s1299_s15 + $0x10] sm:$0xff] %vm603_vm1, %v695_v19  ;;  %v690_v24 = vmul.f32 %v682_v18, %v650_v20 }
 0x199   : > { %v698_v28 = vadd.f32 %v690_v24, %v670_v22 }
 0x19a   : > { %v664_v29 = vpop.f32.mrf.mxu2 }
 0x19b   : > { %706 = vst.msk [vmem:[%s1299_s15 + $0x28] sm:$0xff] %vm603_vm1, %v698_v28  ;;  %v665_v30 = vadd.f32 %v664_v29, %v1286_v36 }
 0x19d   : > { %v696_v31 = vadd.f32 %v688_v26, %v665_v30 }
 0x19f   : > { %704 = vst.msk [vmem:[%s1299_s15 + $0x18] sm:$0xff] %vm603_vm1, %v696_v31 }
 0x1a0   : > { %1008 = shalt.err (!%p1005_p5)
}
 0x1a1   : > { %s1062_s13 = smov 128   ;;  %s1063_s15 = smov 8  }
 0x1a2   : > { %920 = dma.vmem_to_hbm [thread:$0]  (%p1139_p4), %s724_s24, 1024, %s726_s20, %s710_s27, %s1062_s13, %s1062_s13, %s1063_s15  }
 0x1a3 PF: > { %p926_p6 = scmp.ge.s32.totalorder %s1059_s26, 2  ;;  %s740_s17 = sand.u32 1, %s1039_s21  }
 0x1a4   : > { %s741_s18 = scalar_lea.sflag [#allocation3], %s740_s17 }
 0x1a5   : > { %p923_p7 = pnand %p926_p6, %p1146_p8 }
 0x1a7   : > { %p924_p9 = pneg %p923_p7 }
 0x1a9   : > { %1034 = dma.done.wait (%p924_p9), %s741_s18, 1024  }
 0x1aa   : > { %1036 = vsyncadd (%p924_p9), %s741_s18, 4294966272  ;;  %s19_s26 = sadd.s32 1, %s1059_s26   ;;  %s1374_s21 = smov %s1043_s22 }
 0x1ab   : > { %p16_p10 = scmp.ge.s32.totalorder %s19_s26, 4   ;;  %s1375_s22 = smov %s1047_s23 }
 0x1ac   : > { %s1376_s23 = smov %s1152_s10  ;;  %s1377_s24 = smov %s1055_s25 }
 0x1ad   : > { %s1378_s25 = smov %s1380_s29  ;;  %18 = sbr.rel (!%p16_p10) target bundleno = 4 (0x4), region = 82 }
 0x1b2   :  { %747 = vsyncpa [#allocation3], 1 }
 0x1b3   :  { %749 = vsyncpa [#allocation3 + $0x1], 1 }

</bundles_post_ra>
